<compile_context>
chip_gen: v5e
topology: v5e:2x2
jax: 0.10.0
libtpu: 0.0.40
codegen_flags: <defaults>
</compile_context>

<pallas_src>
import jax
import jax.numpy as jnp
from jax.experimental import pallas as pl
from jax.experimental.pallas import tpu as pltpu


def classifier_kernel(x_ref, o_ref):
    # Empty nn.Sequential == identity.
    o_ref[...] = x_ref[...]


def _lane_dense_2d(x):
    """Flatten to a 2-D (rows, lanes) slab with a lane-dense last dim.

    Prefers a wide lane width (multiple of 128) when the total element count
    allows; otherwise falls back to the array's own last dim.
    """
    total = int(x.size)
    for lane_width in (1024, 512, 256, 128):
        if total % lane_width == 0:
            return x.reshape(total // lane_width, lane_width)
    if x.ndim >= 2:
        return x.reshape(-1, x.shape[-1])
    return x.reshape(1, max(total, 1))


def _row_tile(rows, cols, itemsize, target_block_bytes=4 << 20):
    """Pick a row tile so one block is ~target_block_bytes, sublane-aligned."""
    sublane = {1: 32, 2: 16}.get(itemsize, 8)
    tb = target_block_bytes // max(cols * itemsize, 1)
    tb = max(sublane, (tb // sublane) * sublane)
    tb = min(tb, rows)
    # If tb is smaller than the full row extent it is a multiple of `sublane`
    # (>= 8), otherwise it equals the full dim — both are legal block shapes.
    if tb < sublane:
        tb = rows
    return tb


def classifier_forward(x, *, materialize=False):
    """Forward pass of `Classifier` (identity).

    materialize=False (default): returns x unchanged — no kernel launch, no
    HBM round trip (the reshape-free identity is metadata-only).
    materialize=True: produces a distinct output buffer via a tiled,
    lane-dense, VMEM-budgeted Pallas copy kernel.
    """
    if not materialize:
        return x

    if x.size == 0:
        return x

    orig_shape = x.shape
    x2 = _lane_dense_2d(x)
    R, C = x2.shape

    itemsize = jnp.dtype(x2.dtype).itemsize
    tb = _row_tile(R, C, itemsize)
    grid = (pl.cdiv(R, tb),)

    out2 = pl.pallas_call(
        classifier_kernel,
        out_shape=jax.ShapeDtypeStruct((R, C), x2.dtype),
        grid=grid,
        in_specs=[pl.BlockSpec((tb, C), lambda i: (i, 0))],
        out_specs=pl.BlockSpec((tb, C), lambda i: (i, 0)),
        compiler_params=pltpu.CompilerParams(
            dimension_semantics=("parallel",),
            vmem_limit_bytes=32 << 20,
        ),
        cost_estimate=pl.CostEstimate(
            flops=0,
            transcendentals=0,
            bytes_accessed=2 * R * C * itemsize),
    )(x2)

    return out2.reshape(orig_shape)


if __name__ == "__main__":
    key = jax.random.PRNGKey(0)
    k1, k2 = jax.random.split(key)

    # Shape implied by a conv-style classifier input: (batch=2, C=4, 16, 16).
    x = jax.random.normal(k1, (2, 4, 16, 16), dtype=jnp.float32)

    # Fast path (default): identity with no kernel launch / no HBM traffic.
    y_fast = jax.block_until_ready(classifier_forward(x))
    assert y_fast.shape == x.shape and y_fast.dtype == x.dtype
    assert bool(jnp.all(y_fast == x))

    # Materialized path: exercises the tiled lane-dense Pallas copy kernel
    # (2*4*16*16 = 2048 elements -> (2, 1024) lane-dense slab, single block).
    y_copy = jax.block_until_ready(classifier_forward(x, materialize=True))
    assert y_copy.shape == x.shape and y_copy.dtype == x.dtype
    assert bool(jnp.all(y_copy == x))

    # Non-128-divisible feature dim: exercises the last-dim fallback layout.
    x2 = jax.random.normal(k2, (8, 200), dtype=jnp.float32)
    y2 = jax.block_until_ready(classifier_forward(x2, materialize=True))
    assert y2.shape == x2.shape and y2.dtype == x2.dtype
    assert bool(jnp.all(y2 == x2))

    # TODO(synk): the module's classifier is an empty nn.Sequential, so there
    # is no learnable computation to fuse; if layers are ever added, extend
    # classifier_kernel with the corresponding ops.
    print("KERNEL_OK")
</pallas_src>

<mosaic_0001>
module attributes {stable_mosaic.version = 11 : i64} {
  func.func @classifier_kernel(%arg0: i32, %arg1: memref<2x1024xf32, #tpu.memory_space<vmem>>, %arg2: memref<2x1024xf32, #tpu.memory_space<vmem>>) attributes {dimension_semantics = [#tpu.dimension_semantics<parallel>], iteration_bounds = array<i64: 1>, scalar_prefetch = 0 : i64, scratch_operands = 0 : i64, tpu.core_type = #tpu.core_type<tc>, window_params = [{transform_indices = @transform_0, window_bounds = array<i64: 2, 1024>}, {transform_indices = @transform_1, window_bounds = array<i64: 2, 1024>}]} {
    %c0 = arith.constant 0 : index
    %c0_0 = arith.constant 0 : index
    %0 = vector.load %arg1[%c0, %c0_0] : memref<2x1024xf32, #tpu.memory_space<vmem>>, vector<2x1024xf32>
    %c0_1 = arith.constant 0 : index
    %c0_2 = arith.constant 0 : index
    %1 = vector.load %arg2[%c0_1, %c0_2] : memref<2x1024xf32, #tpu.memory_space<vmem>>, vector<2x1024xf32>
    tpu.vector_store %arg2[%c0_1, %c0_2], %0 {strides = array<i32>} : memref<2x1024xf32, #tpu.memory_space<vmem>>, vector<2x1024xf32>,
    return
  }
  func.func @transform_0(%arg0: i32) -> (i32, i32) {
    %c0_i32 = arith.constant 0 : i32
    %c0_i32_0 = arith.constant 0 : i32
    return %arg0, %c0_i32 : i32, i32
  }
  func.func @transform_1(%arg0: i32) -> (i32, i32) {
    %c0_i32 = arith.constant 0 : i32
    %c0_i32_0 = arith.constant 0 : i32
    return %arg0, %c0_i32 : i32, i32
  }
}

</mosaic_0001>

<bundles_post_ra>
// kernel: tpu_custom_call.1
= control target key start
LH: loop header
LB: loop body
LE: loop exit
PB: predicated region body
PF: predicated region fallthrough
CT: control target
= control target key end

     0   :  { %6 = vsyncpa [#allocation3], 0  ;;  %s116_s0 = inlined_call_operand.hbm [shape: f32[2,1024], index: 0, kind: input, shape index: {}]   ;;  %s117_s1 = inlined_call_operand.hbm [shape: f32[2,1024], index: 1, kind: output, shape index: {}]  }
   0x1   :  { %7 = vsyncpa [#allocation4], 0  ;;  %s13_s8 = sshll.u32 %s116_s0, 4  ;;  %s98_s9 = smov [#allocation2]   ;;  %s14_s8 = int_to_ptr.hbm [resolvable:$true] %s13_s8 }
   0x2   :  { %s15_s10 = sshll.u32 %s98_s9, 4  ;;  %s16_s10 = int_to_ptr.vmem [resolvable:$true] %s15_s10 }
   0x3   :  { %18 = dma.hbm_to_vmem [thread:$0]  %s14_s8, 256, %s16_s10, [#allocation3]  }
   0x4   :  { %94 = dma.done.wait [#allocation3], 256  }
   0x5   :  { %95 = vsyncadd [#allocation3], 4294967040  ;;  %s99_s11 = smov [#allocation5]   ;;  %s34_s15 = sshll.u32 %s117_s1, 4  ;;  %v23_v0 = vld [vmem:[#allocation2] sm:$0xff]  ;;  %v24_v1 = vld [vmem:[#allocation2 + $0x8] sm:$0xff]  ;;  %s35_s15 = int_to_ptr.hbm [resolvable:$true] %s34_s15 }
   0x6   :  { %s32_s12 = sshll.u32 %s99_s11, 4  ;;  %25 = vst [vmem:[#allocation5] sm:$0xff] %v23_v0  ;;  %s33_s12 = int_to_ptr.vmem [resolvable:$true] %s32_s12 }
   0x7   :  { %26 = vst [vmem:[#allocation5 + $0x8] sm:$0xff] %v24_v1 }
   0x8   :  { %37 = dma.vmem_to_hbm [thread:$0]  %s33_s12, 256, %s35_s15, [#allocation4]  }
   0x9   :  { %96 = dma.done.wait [#allocation4], 256  }
   0xa   :  { %97 = vsyncadd [#allocation4], 4294967040 }
   0xb   :  { %42 = vsyncpa [#allocation3], 1 }
   0xc   :  { %43 = vsyncpa [#allocation4], 1 }

</bundles_post_ra>
